<compile_context>
chip_gen: v7x
topology: tpu7x:2x2x1
jax: 0.10.0
libtpu: 0.0.40
codegen_flags: <defaults>
</compile_context>

<pallas_src>
import functools

import jax
import jax.numpy as jnp
from jax.experimental import pallas as pl
from jax.experimental.pallas import tpu as pltpu

C_SE_IN = 10   # conv2d31 in-channels
C_MID = 240    # conv2d31 out-channels == x92 channels
C_OUT = 40     # conv2d32 out-channels


def _se_proj_kernel(w_ref, x_ref, o_ref):
    # w_ref: [C_OUT, C_MID]   gate-folded projection weight for this batch item
    # x_ref: [C_MID, tile_hw] NCHW-native spatial tile (channels x positions)
    # o_ref: [C_OUT, tile_hw] lane-dense output tile (directly NCHW)
    o_ref[...] = jnp.dot(
        w_ref[...], x_ref[...], preferred_element_type=jnp.float32
    ).astype(o_ref.dtype)


@functools.partial(jax.jit, static_argnames=("tile_hw",))
def se_block(x95, x92, w1, b1, w2, *, tile_hw=512):
    """Forward pass of module M.

    x95: [N, 10, 1, 1]   (SE squeeze input, NCHW)
    x92: [N, 240, H, W]  (feature map, NCHW)
    w1:  [240, 10]  conv2d31 weight (PyTorch [out, in, 1, 1] squeezed)
    b1:  [240]      conv2d31 bias
    w2:  [40, 240]  conv2d32 weight (PyTorch [out, in, 1, 1] squeezed), no bias
    Returns x99: [N, 40, H, W]
    """
    n, c_mid, h, w = x92.shape
    assert c_mid == C_MID
    assert tile_hw % 128 == 0
    hw = h * w

    # ---- Grid-invariant SE gate, folded once into the projection weight. ----
    s = jax.nn.sigmoid(x95.reshape(n, C_SE_IN) @ w1.T + b1[None, :])       # [N, 240]
    w2_fold = (w2[None, :, :] * s[:, None, :]).astype(x92.dtype)           # [N, 40, 240]

    # ---- NCHW-native flatten: pure reshape, no transpose pass over HBM. ----
    x_flat = x92.reshape(n, C_MID, hw)                                     # [N, 240, HW]

    # Clamp the tile so a single padded block never wildly exceeds HW.
    tile = min(tile_hw, pl.cdiv(hw, 128) * 128)
    grid = (n, pl.cdiv(hw, tile))

    bytes_el = jnp.dtype(x92.dtype).itemsize
    cost = pl.CostEstimate(
        flops=2 * n * hw * C_MID * C_OUT,
        transcendentals=0,
        bytes_accessed=n * hw * (C_MID + C_OUT) * bytes_el
        + n * C_OUT * C_MID * bytes_el,
    )

    out_flat = pl.pallas_call(
        _se_proj_kernel,
        out_shape=jax.ShapeDtypeStruct((n, C_OUT, hw), x92.dtype),
        grid_spec=pltpu.PrefetchScalarGridSpec(
            num_scalar_prefetch=0,
            grid=grid,
            in_specs=[
                pl.BlockSpec((None, C_OUT, C_MID), lambda b, i: (b, 0, 0)),  # W2'
                pl.BlockSpec((None, C_MID, tile), lambda b, i: (b, 0, i)),   # x tile
            ],
            out_specs=pl.BlockSpec((None, C_OUT, tile), lambda b, i: (b, 0, i)),
        ),
        compiler_params=pltpu.CompilerParams(
            dimension_semantics=("parallel", "parallel")
        ),
        cost_estimate=cost,
    )(w2_fold, x_flat)

    # [N, C_OUT, HW] -> NCHW by pure reshape (no transpose).
    return out_flat.reshape(n, C_OUT, h, w)


def _reference(x95, x92, w1, b1, w2):
    n, _, h, w = x92.shape
    s = jax.nn.sigmoid(x95.reshape(n, C_SE_IN) @ w1.T + b1[None, :])       # [N, 240]
    x98 = x92 * s[:, :, None, None]                                        # [N,240,H,W]
    y = jnp.einsum("oc,ncp->nop", w2, x98.reshape(n, C_MID, h * w))
    return y.reshape(n, C_OUT, h, w)


if __name__ == "__main__":
    key = jax.random.PRNGKey(0)
    k1, k2, k3, k4, k5 = jax.random.split(key, 5)

    # Channel counts are fixed by the module's conv weights; spatial kept small
    # (the real model uses 56x56).  Second case: N=2 and hw=400, which does NOT
    # divide the 128-lane tile -> exercises the ragged last block + batch axis.
    w1 = 0.1 * jax.random.normal(k3, (C_MID, C_SE_IN), jnp.float32)   # conv2d31 weight
    b1 = 0.1 * jax.random.normal(k4, (C_MID,), jnp.float32)           # conv2d31 bias
    w2 = 0.1 * jax.random.normal(k5, (C_OUT, C_MID), jnp.float32)     # conv2d32 weight

    for (n, hh, ww, tile_hw) in ((1, 16, 16, 128), (2, 20, 20, 128)):
        xk1, xk2 = jax.random.split(jax.random.fold_in(k1, hh), 2)
        x92 = jax.random.normal(xk1, (n, C_MID, hh, ww), jnp.float32)
        x95 = jax.random.normal(xk2, (n, C_SE_IN, 1, 1), jnp.float32)

        out = se_block(x95, x92, w1, b1, w2, tile_hw=tile_hw)
        out = jax.block_until_ready(out)

        ref = _reference(x95, x92, w1, b1, w2)
        assert out.shape == (n, C_OUT, hh, ww), out.shape
        err = float(jnp.max(jnp.abs(out - ref)))
        assert jnp.allclose(out, ref, atol=1e-3, rtol=1e-3), err

    print("KERNEL_OK")
</pallas_src>

<mosaic_0001>
module attributes {stable_mosaic.version = 11 : i64} {
  func.func @_se_proj_kernel(%arg0: i32, %arg1: i32, %arg2: memref<1x40x240xf32, #tpu.memory_space<vmem>>, %arg3: memref<1x240x128xf32, #tpu.memory_space<vmem>>, %arg4: memref<1x40x128xf32, #tpu.memory_space<vmem>>) attributes {dimension_semantics = [#tpu.dimension_semantics<parallel>, #tpu.dimension_semantics<parallel>], iteration_bounds = array<i64: 1, 2>, scalar_prefetch = 0 : i64, scratch_operands = 0 : i64, tpu.core_type = #tpu.core_type<tc>, window_params = [{transform_indices = @transform_0, window_bounds = array<i64: 1, 40, 240>}, {transform_indices = @transform_1, window_bounds = array<i64: 1, 240, 128>}, {transform_indices = @transform_2, window_bounds = array<i64: 1, 40, 128>}]} {
    %c0 = arith.constant 0 : index
    %c0_0 = arith.constant 0 : index
    %c0_1 = arith.constant 0 : index
    %0 = vector.load %arg2[%c0, %c0_0, %c0_1] : memref<1x40x240xf32, #tpu.memory_space<vmem>>, vector<1x40x240xf32>
    %1 = vector.shape_cast %0 : vector<1x40x240xf32> to vector<40x240xf32>
    %c0_2 = arith.constant 0 : index
    %c0_3 = arith.constant 0 : index
    %c0_4 = arith.constant 0 : index
    %2 = vector.load %arg3[%c0_2, %c0_3, %c0_4] : memref<1x240x128xf32, #tpu.memory_space<vmem>>, vector<1x240x128xf32>
    %3 = vector.shape_cast %2 : vector<1x240x128xf32> to vector<240x128xf32>
    %cst = arith.constant dense<0.000000e+00> : vector<40x128xf32>
    %4 = tpu.matmul %1, %3, %cst {dimension_numbers = #tpu.dot_dimension_numbers<[1], [0], [0], [1], [0, 0, 1, 1], [], []>} : vector<40x240xf32>, vector<240x128xf32>, vector<40x128xf32> -> vector<40x128xf32>
    %c0_5 = arith.constant 0 : index
    %c0_6 = arith.constant 0 : index
    %c0_7 = arith.constant 0 : index
    %5 = vector.load %arg4[%c0_5, %c0_6, %c0_7] : memref<1x40x128xf32, #tpu.memory_space<vmem>>, vector<1x40x128xf32>
    %6 = vector.shape_cast %5 : vector<1x40x128xf32> to vector<40x128xf32>
    %7 = vector.shape_cast %4 : vector<40x128xf32> to vector<1x40x128xf32>
    tpu.vector_store %arg4[%c0_5, %c0_6, %c0_7], %7 {strides = array<i32>} : memref<1x40x128xf32, #tpu.memory_space<vmem>>, vector<1x40x128xf32>,
    return
  }
  func.func @transform_0(%arg0: i32, %arg1: i32) -> (i32, i32, i32) {
    %c0_i32 = arith.constant 0 : i32
    %c0_i32_0 = arith.constant 0 : i32
    %c0_i32_1 = arith.constant 0 : i32
    return %arg0, %c0_i32, %c0_i32_0 : i32, i32, i32
  }
  func.func @transform_1(%arg0: i32, %arg1: i32) -> (i32, i32, i32) {
    %c0_i32 = arith.constant 0 : i32
    %c0_i32_0 = arith.constant 0 : i32
    return %arg0, %c0_i32, %arg1 : i32, i32, i32
  }
  func.func @transform_2(%arg0: i32, %arg1: i32) -> (i32, i32, i32) {
    %c0_i32 = arith.constant 0 : i32
    %c0_i32_0 = arith.constant 0 : i32
    return %arg0, %c0_i32, %arg1 : i32, i32, i32
  }
}

</mosaic_0001>

<bundles_post_ra>
// kernel: se_block.1
= control target key start
LH: loop header
LB: loop body
LE: loop exit
PB: predicated region body
PF: predicated region fallthrough
CT: control target
= control target key end

     0   :  { %s810_s9 = smov 0   ;;  %s812_s10 = smov 0   ;;  %s1047_s0 = inlined_call_operand.vmem [shape: f32[1,40,240], index: 0, kind: input, shape index: {}]   ;;  %s1048_s1 = inlined_call_operand.vmem [shape: f32[1,240,256], index: 1, kind: input, shape index: {}]   ;;  %s1049_s2 = inlined_call_operand.vmem [shape: f32[1,40,256], index: 2, kind: output, shape index: {}]  }
   0x1   :  { %s814_s11 = smov 0   ;;  %s816_s12 = smov 0  }
   0x2   :  { %s818_s13 = smov 0  }
   0x3 LB: > { %s21_s14 = sadd.s32 1, %s788_s12  ;;  %s620_s15 = sadd.s32 4294967295, %s792_s13   ;;  %s792_s13 = sphi %s818_s13, %s12_s13   ;;  %s788_s12 = sphi %s816_s12, %s1054_s12   ;;  %s784_s11 = sphi %s814_s11, %s1053_s11   ;;  %s780_s10 = sphi %s812_s10, %s1052_s10   ;;  %s776_s9 = sphi %s810_s9, %s1051_s9  }
   0x4   : > { %p22_p0 = scmp.ge.s32.totalorder %s21_s14, 2  ;;  %p66_p1 = scmp.ne.s32.totalorder %s780_s10, %s776_s9 }
   0x5   : > { %p67_p2 = scmp.eq.s32.totalorder %s792_s13, 0  ;;  %p98_p4 = scmp.eq.s32.totalorder %s620_s15, 1 }
   0x6   : > { %s1056_s14 = smov (%p22_p0, %s21_s14), 0  ;;  %s59_s17 = sadd.s32 1, %s780_s10 }
   0x7   : > { %p68_p3 = por %p67_p2, %p66_p1  ;;  %s55_s16 = ssub.s32 %s788_s12, %s1056_s14 }
   0x8   : > { %p57_p5 = scmp.eq.s32.totalorder %s55_s16, 0  ;;  %p845_p6 = por %p98_p4, %p66_p1 }
   0x9   : > { %p624_p7 = scmp.ge.s32.totalorder %s792_s13, 2 }
   0xa   : > { %s850_s19 = scalar_select %p57_p5, %s780_s10, %s59_s17  }
   0xb   : > { %128 = sbr.rel (%p624_p7) target bundleno = 37 (0x25), region = 20 }
  0x12   : > { %131 = sbr.rel (!%p68_p3) target bundleno = 37 (0x25), region = 24  ;;  %s133_s20 = sand.u32 (%p68_p3), 1, %s780_s10  }
  0x13   : > { %s625_s21 = sshll.u32 (%p68_p3), %s788_s12, 3  ;;  %s710_s22 = smul.u32 (%p68_p3), 240, %s133_s20 }
  0x14   : > { %s858_s25 = scalar_lea.vmem (%p68_p3), %s1048_s1, %s625_s21 }
  0x15   : > { %v225_v0 = vld [vmem:[%s858_s25] sm:$0xff] (%p68_p3)  ;;  %v227_v1 = vld [vmem:[%s858_s25 + $0x10] sm:$0xff] (%p68_p3)  ;;  %s866_s26 = scalar_lea.vmem (%p68_p3), [#allocation2], %s710_s22 }
  0x16   : > { %v229_v2 = vld [vmem:[%s858_s25 + $0x20] sm:$0xff] (%p68_p3)  ;;  %v231_v3 = vld [vmem:[%s858_s25 + $0x30] sm:$0xff] (%p68_p3)  ;;  %226 = vst [vmem:[%s866_s26] sm:$0xff] (%p68_p3), %v225_v0  ;;  %228 = vst [vmem:[%s866_s26 + $0x8] sm:$0xff] (%p68_p3), %v227_v1 }
  0x17   : > { %v233_v4 = vld [vmem:[%s858_s25 + $0x40] sm:$0xff] (%p68_p3)  ;;  %v235_v5 = vld [vmem:[%s858_s25 + $0x50] sm:$0xff] (%p68_p3)  ;;  %230 = vst [vmem:[%s866_s26 + $0x10] sm:$0xff] (%p68_p3), %v229_v2  ;;  %232 = vst [vmem:[%s866_s26 + $0x18] sm:$0xff] (%p68_p3), %v231_v3 }
  0x18   : > { %234 = vst [vmem:[%s866_s26 + $0x20] sm:$0xff] (%p68_p3), %v233_v4  ;;  %236 = vst [vmem:[%s866_s26 + $0x28] sm:$0xff] (%p68_p3), %v235_v5  ;;  %v237_v6 = vld [vmem:[%s858_s25 + $0x60] sm:$0xff] (%p68_p3)  ;;  %v239_v7 = vld [vmem:[%s858_s25 + $0x70] sm:$0xff] (%p68_p3) }
  0x19   : > { %v241_v8 = vld [vmem:[%s858_s25 + $0x80] sm:$0xff]  ;;  %238 = vst [vmem:[%s866_s26 + $0x30] sm:$0xff] %v237_v6  ;;  %240 = vst [vmem:[%s866_s26 + $0x38] sm:$0xff] %v239_v7  ;;  %v243_v9 = vld [vmem:[%s858_s25 + $0x90] sm:$0xff] }
  0x1a   : > { %242 = vst [vmem:[%s866_s26 + $0x40] sm:$0xff] %v241_v8  ;;  %v245_v10 = vld [vmem:[%s858_s25 + $0xa0] sm:$0xff]  ;;  %v247_v11 = vld [vmem:[%s858_s25 + $0xb0] sm:$0xff]  ;;  %244 = vst [vmem:[%s866_s26 + $0x48] sm:$0xff] %v243_v9 }
  0x1b   : > { %246 = vst [vmem:[%s866_s26 + $0x50] sm:$0xff] %v245_v10  ;;  %248 = vst [vmem:[%s866_s26 + $0x58] sm:$0xff] %v247_v11  ;;  %v249_v12 = vld [vmem:[%s858_s25 + $0xc0] sm:$0xff]  ;;  %v251_v13 = vld [vmem:[%s858_s25 + $0xd0] sm:$0xff] }
  0x1c   : > { %v253_v14 = vld [vmem:[%s858_s25 + $0xe0] sm:$0xff]  ;;  %250 = vst [vmem:[%s866_s26 + $0x60] sm:$0xff] %v249_v12  ;;  %252 = vst [vmem:[%s866_s26 + $0x68] sm:$0xff] %v251_v13  ;;  %v255_v15 = vld [vmem:[%s858_s25 + $0xf0] sm:$0xff] }
  0x1d   : > { %254 = vst [vmem:[%s866_s26 + $0x70] sm:$0xff] %v253_v14  ;;  %v257_v16 = vld [vmem:[%s858_s25 + $0x100] sm:$0xff]  ;;  %v259_v17 = vld [vmem:[%s858_s25 + $0x110] sm:$0xff]  ;;  %256 = vst [vmem:[%s866_s26 + $0x78] sm:$0xff] %v255_v15 }
  0x1e   : > { %258 = vst [vmem:[%s866_s26 + $0x80] sm:$0xff] %v257_v16  ;;  %260 = vst [vmem:[%s866_s26 + $0x88] sm:$0xff] %v259_v17  ;;  %v261_v18 = vld [vmem:[%s858_s25 + $0x120] sm:$0xff]  ;;  %v263_v19 = vld [vmem:[%s858_s25 + $0x130] sm:$0xff] }
  0x1f   : > { %v265_v20 = vld [vmem:[%s858_s25 + $0x140] sm:$0xff]  ;;  %262 = vst [vmem:[%s866_s26 + $0x90] sm:$0xff] %v261_v18  ;;  %264 = vst [vmem:[%s866_s26 + $0x98] sm:$0xff] %v263_v19  ;;  %v267_v21 = vld [vmem:[%s858_s25 + $0x150] sm:$0xff] }
  0x20   : > { %266 = vst [vmem:[%s866_s26 + $0xa0] sm:$0xff] %v265_v20  ;;  %v269_v22 = vld [vmem:[%s858_s25 + $0x160] sm:$0xff]  ;;  %v271_v23 = vld [vmem:[%s858_s25 + $0x170] sm:$0xff]  ;;  %268 = vst [vmem:[%s866_s26 + $0xa8] sm:$0xff] %v267_v21 }
  0x21   : > { %270 = vst [vmem:[%s866_s26 + $0xb0] sm:$0xff] %v269_v22  ;;  %272 = vst [vmem:[%s866_s26 + $0xb8] sm:$0xff] %v271_v23  ;;  %v273_v24 = vld [vmem:[%s858_s25 + $0x180] sm:$0xff]  ;;  %v275_v25 = vld [vmem:[%s858_s25 + $0x190] sm:$0xff] }
  0x22   : > { %v277_v26 = vld [vmem:[%s858_s25 + $0x1a0] sm:$0xff]  ;;  %274 = vst [vmem:[%s866_s26 + $0xc0] sm:$0xff] %v273_v24  ;;  %276 = vst [vmem:[%s866_s26 + $0xc8] sm:$0xff] %v275_v25  ;;  %v279_v27 = vld [vmem:[%s858_s25 + $0x1b0] sm:$0xff] }
  0x23   : > { %278 = vst [vmem:[%s866_s26 + $0xd0] sm:$0xff] %v277_v26  ;;  %v281_v28 = vld [vmem:[%s858_s25 + $0x1c0] sm:$0xff]  ;;  %v283_v29 = vld [vmem:[%s858_s25 + $0x1d0] sm:$0xff]  ;;  %280 = vst [vmem:[%s866_s26 + $0xd8] sm:$0xff] %v279_v27 }
  0x24   : > { %282 = vst [vmem:[%s866_s26 + $0xe0] sm:$0xff] %v281_v28  ;;  %284 = vst [vmem:[%s866_s26 + $0xe8] sm:$0xff] %v283_v29 }
  0x25 PF: > { %p626_p8 = scmp.ge.s32.totalorder %s792_s13, 1  ;;  %p289_p9 = scmp.lt.s32.totalorder %s792_s13, 3 }
  0x27   : > { %p290_p10 = pnand %p626_p8, %p289_p9 }
  0x28   : > { %s296_s27 = sand.u32 (!%p290_p10), 1, %s776_s9   ;;  %v327_v30 = vld [vmem:[%s1047_s0 + $0x8] sm:$0xff] (!%p290_p10)  ;;  %vm366_vm0 = vcmask (!%p290_p10), 916480   ;;  %v333_v31 = vld [vmem:[%s1047_s0 + $0x38] sm:$0xff] (!%p290_p10)  ;;  %v794_v32 = vmov (!%p290_p10), 0.0|0.0   ;;  %v326_v14 = vld [vmem:[%s1047_s0] sm:$0xff] (!%p290_p10) }
  0x29   : > { %293 = sbr.rel (%p290_p10) target bundleno = 336 (0x150), region = 62  ;;  %635 = vmatprep.subr.bf16.mxu0 (!%p290_p10), %v794_v32  ;;  %680 = vmatprep.subr.bf16.mxu1 (!%p290_p10), %v794_v32  ;;  %v332_v15 = vld [vmem:[%s1047_s0 + $0x30] sm:$0xff] (!%p290_p10)  ;;  %v329_v16 = vld [vmem:[%s1047_s0 + $0x18] sm:$0xff] (!%p290_p10)  ;;  %v335_v17 = vld [vmem:[%s1047_s0 + $0x48] sm:$0xff] (!%p290_p10) }
  0x2a   : > { %s711_s4 = smul.u32 (!%p290_p10), 240, %s296_s27  ;;  %627 = vmatprep.mubr.msk.f32.mxu0 (!%p290_p10), %vm366_vm0, %v327_v30  ;;  %630 = vmatprep.mubr.msk.f32.mxu1 (!%p290_p10), %vm366_vm0, %v333_v31  ;;  %v328_v18 = vld [vmem:[%s1047_s0 + $0x10] sm:$0xff] (!%p290_p10)  ;;  %v334_v19 = vld [vmem:[%s1047_s0 + $0x40] sm:$0xff] (!%p290_p10)  ;;  %v331_v20 = vld [vmem:[%s1047_s0 + $0x28] sm:$0xff] (!%p290_p10) }
  0x2b   : > { %v330_v21 = vld [vmem:[%s1047_s0 + $0x20] sm:$0xff] (!%p290_p10)  ;;  %s712_s3 = smul.u32 (!%p290_p10), 40, %s296_s27 }
  0x2c   : > { %s937_s5 = scalar_lea.vmem (!%p290_p10), [#allocation2], %s711_s4 }
  0x2d   : > { %v336_v33 = vld [vmem:[%s937_s5] sm:$0xff] (!%p290_p10)  ;;  %v337_v34 = vld [vmem:[%s937_s5 + $0x8] sm:$0xff] (!%p290_p10)  ;;  %v338_v35 = vld [vmem:[%s937_s5 + $0x10] sm:$0xff] (!%p290_p10)  ;;  %s320_s4 = scalar_lea.vmem (!%p290_p10), [#allocation3], %s712_s3 }
  0x2e   : > { %v636_v36 = vpack.c.bf16 (!%p290_p10), %v337_v34, %v336_v33  ;;  %v339_v37 = vld [vmem:[%s937_s5 + $0x18] sm:$0xff] (!%p290_p10)  ;;  %v340_v39 = vld [vmem:[%s937_s5 + $0x20] sm:$0xff] (!%p290_p10)  ;;  %v341_v40 = vld [vmem:[%s937_s5 + $0x28] sm:$0xff] (!%p290_p10) }
  0x2f   : > { %v639_v38 = vpack.c.bf16 (!%p290_p10), %v339_v37, %v338_v35  ;;  %v642_v41 = vpack.c.bf16 (!%p290_p10), %v341_v40, %v340_v39  ;;  %v342_v42 = vld [vmem:[%s937_s5 + $0x30] sm:$0xff] (!%p290_p10)  ;;  %v343_v43 = vld [vmem:[%s937_s5 + $0x38] sm:$0xff] (!%p290_p10)  ;;  %v344_v45 = vld [vmem:[%s937_s5 + $0x40] sm:$0xff] (!%p290_p10) }
  0x30   : > { %637 = vmatpush1.bf16.msra.mxu0 %v636_v36  ;;  %695 = vmatpush1.bf16.msra.mxu1 %v636_v36  ;;  %v645_v44 = vpack.c.bf16 %v343_v43, %v342_v42  ;;  %v345_v46 = vld [vmem:[%s937_s5 + $0x48] sm:$0xff]  ;;  %v346_v48 = vld [vmem:[%s937_s5 + $0x50] sm:$0xff]  ;;  %v347_v49 = vld [vmem:[%s937_s5 + $0x58] sm:$0xff]  ;;  %s632_s9 = sshll.u32 (%p845_p6), %s784_s11, 3 }
  0x31   : > { %638 = vmatprep.subr.bf16.mxu0 %v794_v32  ;;  %681 = vmatprep.subr.bf16.mxu1 %v794_v32  ;;  %v648_v47 = vpack.c.bf16 %v345_v46, %v344_v45  ;;  %v651_v50 = vpack.c.bf16 %v347_v49, %v346_v48  ;;  %v348_v51 = vld [vmem:[%s937_s5 + $0x60] sm:$0xff]  ;;  %v349_v52 = vld [vmem:[%s937_s5 + $0x68] sm:$0xff]  ;;  %v350_v54 = vld [vmem:[%s937_s5 + $0x70] sm:$0xff]  ;;  %s487_s6 = scalar_lea.vmem (%p845_p6), %s1049_s2, %s632_s9 }
  0x32   : > { %v654_v53 = vpack.c.bf16 %v349_v52, %v348_v51  ;;  %v351_v55 = vld [vmem:[%s937_s5 + $0x78] sm:$0xff]  ;;  %v352_v57 = vld [vmem:[%s937_s5 + $0x80] sm:$0xff]  ;;  %v353_v58 = vld [vmem:[%s937_s5 + $0x88] sm:$0xff] }
  0x33   : > { %v657_v56 = vpack.c.bf16 %v351_v55, %v350_v54  ;;  %v660_v59 = vpack.c.bf16 %v353_v58, %v352_v57  ;;  %v354_v60 = vld [vmem:[%s937_s5 + $0x90] sm:$0xff]  ;;  %v355_v61 = vld [vmem:[%s937_s5 + $0x98] sm:$0xff]  ;;  %v356_v63 = vld [vmem:[%s937_s5 + $0xa0] sm:$0xff] }
  0x34   : > { %640 = vmatpush1.bf16.msra.mxu0 %v639_v38  ;;  %696 = vmatpush1.bf16.msra.mxu1 %v639_v38  ;;  %v663_v62 = vpack.c.bf16 %v355_v61, %v354_v60  ;;  %v357_v0 = vld [vmem:[%s937_s5 + $0xa8] sm:$0xff]  ;;  %v358_v2 = vld [vmem:[%s937_s5 + $0xb0] sm:$0xff]  ;;  %v359_v3 = vld [vmem:[%s937_s5 + $0xb8] sm:$0xff] }
  0x35   : > { %641 = vmatprep.subr.bf16.mxu0 %v794_v32  ;;  %682 = vmatprep.subr.bf16.mxu1 %v794_v32  ;;  %v666_v1 = vpack.c.bf16 %v357_v0, %v356_v63  ;;  %v669_v4 = vpack.c.bf16 %v359_v3, %v358_v2  ;;  %v360_v5 = vld [vmem:[%s937_s5 + $0xc0] sm:$0xff]  ;;  %v361_v6 = vld [vmem:[%s937_s5 + $0xc8] sm:$0xff]  ;;  %v362_v8 = vld [vmem:[%s937_s5 + $0xd0] sm:$0xff] }
  0x36   : > { %v672_v7 = vpack.c.bf16 %v361_v6, %v360_v5  ;;  %v363_v9 = vld [vmem:[%s937_s5 + $0xd8] sm:$0xff]  ;;  %v364_v11 = vld [vmem:[%s937_s5 + $0xe0] sm:$0xff]  ;;  %v365_v12 = vld [vmem:[%s937_s5 + $0xe8] sm:$0xff] }
  0x37   : > { %v675_v10 = vpack.c.bf16 %v363_v9, %v362_v8  ;;  %v678_v13 = vpack.c.bf16 %v365_v12, %v364_v11 }
  0x38   : > { %643 = vmatpush1.bf16.msra.mxu0 %v642_v41  ;;  %697 = vmatpush1.bf16.msra.mxu1 %v642_v41 }
  0x39   : > { %644 = vmatprep.subr.bf16.mxu0 %v794_v32  ;;  %683 = vmatprep.subr.bf16.mxu1 %v794_v32 }
  0x3c   : > { %646 = vmatpush1.bf16.msra.mxu0 %v645_v44  ;;  %698 = vmatpush1.bf16.msra.mxu1 %v645_v44 }
  0x3d   : > { %647 = vmatprep.subr.bf16.mxu0 %v794_v32  ;;  %684 = vmatprep.subr.bf16.mxu1 %v794_v32 }
  0x40   : > { %649 = vmatpush1.bf16.msra.mxu0 %v648_v47  ;;  %699 = vmatpush1.bf16.msra.mxu1 %v648_v47 }
  0x41   : > { %650 = vmatprep.subr.bf16.mxu0 %v794_v32  ;;  %685 = vmatprep.subr.bf16.mxu1 %v794_v32 }
  0x44   : > { %652 = vmatpush1.bf16.msra.mxu0 %v651_v50  ;;  %700 = vmatpush1.bf16.msra.mxu1 %v651_v50 }
  0x45   : > { %653 = vmatprep.subr.bf16.mxu0 %v794_v32  ;;  %686 = vmatprep.subr.bf16.mxu1 %v794_v32 }
  0x48   : > { %655 = vmatpush1.bf16.msra.mxu0 %v654_v53  ;;  %701 = vmatpush1.bf16.msra.mxu1 %v654_v53 }
  0x49   : > { %656 = vmatprep.subr.bf16.mxu0 %v794_v32  ;;  %687 = vmatprep.subr.bf16.mxu1 %v794_v32 }
  0x4c   : > { %658 = vmatpush1.bf16.msra.mxu0 %v657_v56  ;;  %702 = vmatpush1.bf16.msra.mxu1 %v657_v56 }
  0x4d   : > { %659 = vmatprep.subr.bf16.mxu0 %v794_v32  ;;  %688 = vmatprep.subr.bf16.mxu1 %v794_v32 }
  0x50   : > { %661 = vmatpush1.bf16.msra.mxu0 %v660_v59  ;;  %703 = vmatpush1.bf16.msra.mxu1 %v660_v59 }
  0x51   : > { %662 = vmatprep.subr.bf16.mxu0 %v794_v32  ;;  %689 = vmatprep.subr.bf16.mxu1 %v794_v32 }
  0x54   : > { %664 = vmatpush1.bf16.msra.mxu0 %v663_v62  ;;  %704 = vmatpush1.bf16.msra.mxu1 %v663_v62 }
  0x55   : > { %665 = vmatprep.subr.bf16.mxu0 %v794_v32  ;;  %690 = vmatprep.subr.bf16.mxu1 %v794_v32 }
  0x58   : > { %667 = vmatpush1.bf16.msra.mxu0 %v666_v1  ;;  %705 = vmatpush1.bf16.msra.mxu1 %v666_v1 }
  0x59   : > { %668 = vmatprep.subr.bf16.mxu0 %v794_v32  ;;  %691 = vmatprep.subr.bf16.mxu1 %v794_v32 }
  0x5c   : > { %670 = vmatpush1.bf16.msra.mxu0 %v669_v4  ;;  %706 = vmatpush1.bf16.msra.mxu1 %v669_v4 }
  0x5d   : > { %671 = vmatprep.subr.bf16.mxu0 %v794_v32  ;;  %692 = vmatprep.subr.bf16.mxu1 %v794_v32 }
  0x60   : > { %673 = vmatpush1.bf16.msra.mxu0 %v672_v7  ;;  %707 = vmatpush1.bf16.msra.mxu1 %v672_v7 }
  0x61   : > { %674 = vmatprep.subr.bf16.mxu0 %v794_v32  ;;  %693 = vmatprep.subr.bf16.mxu1 %v794_v32 }
  0x64   : > { %676 = vmatpush1.bf16.msra.mxu0 %v675_v10  ;;  %708 = vmatpush1.bf16.msra.mxu1 %v675_v10 }
  0x65   : > { %677 = vmatprep.subr.bf16.mxu0 %v794_v32  ;;  %694 = vmatprep.subr.bf16.mxu1 %v794_v32 }
  0x68   : > { %679 = vmatpush1.bf16.msra.mxu0 %v678_v13  ;;  %709 = vmatpush1.bf16.msra.mxu1 %v678_v13 }
  0x6b   : > { %447 = vmatmul.mubr.f32.vlgmr.msra.gmra.mrb[0].mxu0 %v326_v14  ;;  %462 = vmatmul.mubr.f32.vlgmr.msra.gmra.mrb[0].mxu1 %v332_v15 }
  0x6c   : > { %628 = vmatprep.mubr.msk.f32.mxu0 %vm366_vm0, %v329_v16  ;;  %631 = vmatprep.mubr.msk.f32.mxu1 %vm366_vm0, %v335_v17 }
  0x6f   : > { %452 = vmatmul.mubr.f32.gmra.mrb[2].mxu0 %v328_v18  ;;  %467 = vmatmul.mubr.f32.gmra.mrb[2].mxu1 %v334_v19 }
  0x70   : > { %629 = vmatprep.mubr.msk.f32.mxu0 %vm366_vm0, %v331_v20 }
  0x73   : > { %457 = vmatmul.mubr.f32.gmra.mrb[4].mxu0 %v330_v21 }
 0x13e   : > { %v448_v22 = vpop.f32.mrb[0].mxu0  ;;  %v463_v23 = vpop.f32.mrb[0].mxu1 }
 0x13f   : > { %472 = vst [vmem:[%s320_s4] sm:$0xff] %v448_v22  ;;  %v450_v24 = vpop.f32.mrb[1].mxu0  ;;  %475 = vst [vmem:[%s320_s4 + $0x18] sm:$0xff] %v463_v23  ;;  %v465_v25 = vpop.f32.mrb[1].mxu1 }
 0x141   : > { %483 = sbr.rel (!%p845_p6) target bundleno = 336 (0x150), region = 70 }
 0x142   : > { %v453_v26 = vpop.f32.mrb[2].mxu0  ;;  %v468_v27 = vpop.f32.mrb[2].mxu1 }
 0x143   : > { %473 = vst [vmem:[%s320_s4 + $0x8] sm:$0xff] %v453_v26  ;;  %v455_v28 = vpop.f32.mrb[3].mxu0  ;;  %476 = vst [vmem:[%s320_s4 + $0x20] sm:$0xff] %v468_v27  ;;  %v470_v29 = vpop.f32.mrb[3].mxu1 }
 0x146   : > { %v458_v30 = vpop.f32.mrb[4].mxu0  ;;  %v523_v32 = vld [vmem:[%s320_s4] sm:$0xff] (%p845_p6)  ;;  %v529_v35 = vld [vmem:[%s320_s4 + $0x18] sm:$0xff] (%p845_p6) }
 0x147   : > { %474 = vst [vmem:[%s320_s4 + $0x10] sm:$0xff] %v458_v30  ;;  %v460_v31 = vpop.f32.mrb[5].mxu0  ;;  %524 = vst [vmem:[%s487_s6] sm:$0xff] (%p845_p6), %v523_v32 }
 0x148   : > { %530 = vst [vmem:[%s487_s6 + $0x30] sm:$0xff] %v529_v35 }
 0x14a   : > { %v525_v33 = vld [vmem:[%s320_s4 + $0x8] sm:$0xff]  ;;  %v531_v36 = vld [vmem:[%s320_s4 + $0x20] sm:$0xff] }
 0x14b   : > { %526 = vst [vmem:[%s487_s6 + $0x10] sm:$0xff] %v525_v33  ;;  %532 = vst [vmem:[%s487_s6 + $0x40] sm:$0xff] %v531_v36 }
 0x14e   : > { %v527_v34 = vld [vmem:[%s320_s4 + $0x10] sm:$0xff] }
 0x14f   : > { %528 = vst [vmem:[%s487_s6 + $0x20] sm:$0xff] %v527_v34 }
 0x150 PF: > { %s12_s13 = sadd.s32 1, %s792_s13   ;;  %s1051_s9 = smov %s780_s10 }
 0x151   : > { %p9_p11 = scmp.ge.s32.totalorder %s12_s13, 4   ;;  %s1052_s10 = smov %s850_s19 }
 0x152   : > { %s1053_s11 = smov %s788_s12  ;;  %s1054_s12 = smov %s1056_s14 }
 0x153   :  { %11 = sbr.rel (!%p9_p11) target bundleno = 3 (0x3), region = 142 }

</bundles_post_ra>
